<compile_context>
chip_gen: v7x
topology: tpu7x:2x2x1
jax: 0.10.0
libtpu: 0.0.40
codegen_flags: <defaults>
</compile_context>

<pallas_src>
import jax
import jax.numpy as jnp
from jax import lax
from jax.experimental import pallas as pl
from jax.experimental.pallas import tpu as pltpu


# ----------------------------------------------------------------------------
# Pallas SliceMax kernel
# ----------------------------------------------------------------------------

def _slicemax_kernel(x_ref, o_ref):
    # x_ref: (tile_n, 2, tile_r, tile_l) VMEM block; o_ref: (tile_n, tile_r, tile_l).
    # The size-2 half axis sits above the tiled sublane/lane dims, so indexing
    # it is just an address offset — no strided in-kernel channel slice.
    o_ref[...] = jnp.maximum(x_ref[:, 0], x_ref[:, 1])


_MIN_PALLAS_BYTES = 1 << 20        # below this total size, fused jnp.maximum wins
_LANE_CAP = 2048                   # max lane extent of the canonical layout


def _sublane_align(dtype):
    """Sublane alignment of the second-minor dim: 8 (f32), 16 (bf16), 32 (i8/fp8)."""
    return max(8, 32 // jnp.dtype(dtype).itemsize)


def _vmem_capacity_bytes():
    """Physical VMEM capacity (trace-time query); defaults to 128 MiB."""
    try:
        cap = int(pltpu.get_tpu_info().vmem_capacity_bytes)
        if cap > 0:
            return cap
    except Exception:
        pass
    return 128 * 1024 * 1024


def _choose_repack(payload, align):
    """Factor payload = R * L with L a multiple of 128 (lane-dense, unmasked
    stores), preferring factorizations whose R keeps sublanes fully occupied
    (R >= align) and, among those, the largest L <= _LANE_CAP.
    Returns (R, L) or None if payload has no multiple-of-128 divisor."""
    payload = int(payload)
    if payload < 128 or payload % 128 != 0:
        return None
    best, best_key = None, (-1, -1)
    lane = 128
    cap = min(payload, _LANE_CAP)
    while lane <= cap:
        if payload % lane == 0:
            rows = payload // lane
            key = (min(rows, align), lane)   # sublane occupancy first, then lane width
            if key > best_key:
                best, best_key = (rows, lane), key
        lane += 128
    return best


def _tile_size(dim, align, cap):
    """Block size for `dim`: the full dim if it fits `cap`; else the largest
    exact divisor of `dim` that is <= cap and a multiple of `align`; else the
    largest multiple of `align` <= cap (the grid then uses pl.cdiv and the
    ragged tail block is masked). Never returns an illegal block extent."""
    dim, cap = int(dim), max(1, int(cap))
    if dim <= cap:
        return dim
    t = (cap // align) * align
    while t >= align:
        if dim % t == 0:
            return t
        t -= align
    return max(align, (cap // align) * align)


def _slice_max_canon(x4):
    """x4: (N, 2, R, L) with L a multiple of 128 -> elementwise max over the
    size-2 axis, output (N, R, L), as a tiled Pallas kernel."""
    n, two, r, l = (int(d) for d in x4.shape)
    assert two == 2
    dtype = x4.dtype
    itemsize = jnp.dtype(dtype).itemsize
    align = _sublane_align(dtype)

    # Generation-aware per-(output)-block budget. Pipeline footprint is ~6x the
    # output block (input block is 2x, both double-buffered): 36 MiB on
    # 128-MiB-VMEM parts (v5e/v6e), 24 MiB on v7x (64 MiB per TensorCore).
    vmem_cap = _vmem_capacity_bytes()
    block_budget = (6 << 20) if vmem_cap >= (100 << 20) else (4 << 20)
    budget_elems = max(128, block_budget // itemsize)

    tile_l = _tile_size(l, 128, budget_elems)
    rem = max(1, budget_elems // tile_l)
    tile_r = _tile_size(r, align, rem)
    rem = max(1, rem // tile_r)
    tile_n = _tile_size(n, 1, rem)

    # Guarantee >= 2 parallel grid steps so both of v7x's TensorCores get work
    # (one extra step costs ~0.35 us; a single step idles half the chip).
    if pl.cdiv(n, tile_n) * pl.cdiv(r, tile_r) * pl.cdiv(l, tile_l) == 1:
        if n >= 2:
            tile_n = (n + 1) // 2
        elif r >= 2 * align:
            tile_r = max(align, (r // 2) // align * align)
        elif l >= 256:
            tile_l = max(128, (l // 2) // 128 * 128)

    grid = (pl.cdiv(n, tile_n), pl.cdiv(r, tile_r), pl.cdiv(l, tile_l))

    in_spec = pl.BlockSpec((tile_n, 2, tile_r, tile_l),
                           lambda i, c, j: (i, 0, c, j))
    out_spec = pl.BlockSpec((tile_n, tile_r, tile_l),
                            lambda i, c, j: (i, c, j))

    out_elems = n * r * l
    tile_bytes = tile_n * tile_r * tile_l * itemsize
    vmem_limit = int(min(vmem_cap * 3 // 4,
                         max(32 << 20, 6 * tile_bytes + (8 << 20))))

    return pl.pallas_call(
        _slicemax_kernel,
        out_shape=jax.ShapeDtypeStruct((n, r, l), dtype),
        grid_spec=pltpu.PrefetchScalarGridSpec(
            num_scalar_prefetch=0,
            grid=grid,
            in_specs=[in_spec],
            out_specs=out_spec,
        ),
        compiler_params=pltpu.CompilerParams(
            dimension_semantics=("parallel", "parallel", "parallel"),
            vmem_limit_bytes=vmem_limit),
        cost_estimate=pl.CostEstimate(
            flops=out_elems,
            transcendentals=0,
            bytes_accessed=3 * out_elems * itemsize),
    )(x4)


def slice_max(x, slice_point=2):
    """SliceMax.forward: elementwise max of the two channel halves. Requires
    the halves to have equal size, i.e. C == 2 * (C // slice_point) — the same
    constraint torch.max(t1, t2) imposes."""
    if x.ndim not in (2, 4):
        raise ValueError("SliceMax expects a 2D or 4D input")
    c = int(x.shape[1])
    split = c // slice_point
    if 2 * split != c:
        raise ValueError(
            f"SliceMax needs equal halves: C={c}, slice_point={slice_point}")

    itemsize = jnp.dtype(x.dtype).itemsize
    align = _sublane_align(x.dtype)

    if x.ndim == 2:
        n = int(x.shape[0])
        payload = split                      # per-batch, per-half elements
        out_shape = (n, split)
    else:
        n, _, h, w = (int(d) for d in x.shape)
        payload = split * h * w
        out_shape = (n, split, h, w)

    total_bytes = x.size * itemsize
    repack = _choose_repack(payload, align)

    # Small / lane-sparse fallback: a standalone pallas_call costs a full HBM
    # round-trip plus pipeline prologue and per-step overhead; for tiny tensors
    # (and most 2D FC inputs) a fused XLA jnp.maximum is strictly faster.
    if total_bytes < _MIN_PALLAS_BYTES or repack is None:
        x3 = x.reshape(n, 2, payload)
        return jnp.maximum(x3[:, 0], x3[:, 1]).reshape(out_shape)

    rows, lanes = repack
    # Free, contiguous reshape: each half's per-batch payload is contiguous,
    # so (N, C[, H, W]) -> (N, 2, rows, lanes) is pure metadata.
    x4 = x.reshape(n, 2, rows, lanes)
    out = _slice_max_canon(x4)
    return out.reshape(out_shape)


# ----------------------------------------------------------------------------
# ConvLayer forward (conv/BN via XLA-native ops, activation via Pallas)
# ----------------------------------------------------------------------------

def conv_layer_forward(x, weight, bias=None, *, stride=1, padding=1,
                       act="elt_wise", bn_params=None, slice_point=2):
    """Mirrors ConvLayer.forward: [dropout] -> conv -> [bn] -> [act].

    bn_params, if given, is (gamma, beta, running_mean, running_var, eps).
    """
    # TODO(synk): nn.Dropout2d is an inference-time no-op; training-mode channel
    # dropout and the conv itself are left to XLA-native ops (no Pallas conv).
    y = lax.conv_general_dilated(
        x, weight,
        window_strides=(stride, stride),
        padding=[(padding, padding), (padding, padding)],
        dimension_numbers=("NCHW", "OIHW", "NCHW"))
    if bias is not None:
        y = y + bias.reshape(1, -1, 1, 1)
    if bn_params is not None:
        gamma, beta, mean, var, eps = bn_params
        inv = lax.rsqrt(var.reshape(1, -1, 1, 1) + eps)
        y = (y - mean.reshape(1, -1, 1, 1)) * inv * gamma.reshape(1, -1, 1, 1) \
            + beta.reshape(1, -1, 1, 1)
    # TODO(synk): folding the bias/BN affine into the SliceMax kernel is left to
    # XLA fusion; the lane-dense repack breaks the per-channel axis mapping.
    if act == "relu":
        y = jnp.maximum(y, 0.0)
    elif act == "elt_wise":
        y = slice_max(y, slice_point=slice_point)
    return y


# ----------------------------------------------------------------------------
# Self-test
# ----------------------------------------------------------------------------

if __name__ == "__main__":
    key = jax.random.PRNGKey(0)
    k_x, k_w, k_b, k_g = jax.random.split(key, 4)

    # --- ConvLayer: in=3, out=4, 16x16, ks=3, s=1, pad=1, act='elt_wise' ----
    N, Cin, Cout, H, W = 2, 3, 4, 16, 16
    x = jax.random.normal(k_x, (N, Cin, H, W), dtype=jnp.float32)
    w = 0.1 * jax.random.normal(k_w, (Cout, Cin, 3, 3), dtype=jnp.float32)
    b = 0.1 * jax.random.normal(k_b, (Cout,), dtype=jnp.float32)

    out = conv_layer_forward(x, w, b, stride=1, padding=1, act="elt_wise")
    out = jax.block_until_ready(out)

    y_ref = lax.conv_general_dilated(
        x, w, window_strides=(1, 1), padding=[(1, 1), (1, 1)],
        dimension_numbers=("NCHW", "OIHW", "NCHW")) + b.reshape(1, -1, 1, 1)
    ref = jnp.maximum(y_ref[:, :Cout // 2], y_ref[:, Cout // 2:])
    assert out.shape == ref.shape, (out.shape, ref.shape)
    assert jnp.allclose(out, ref, atol=1e-5, rtol=1e-5), "ConvLayer mismatch"

    # --- ConvLayer with BN (affine folded in wrapper, elt_wise act) ---------
    gamma = 1.0 + 0.1 * jax.random.normal(k_g, (Cout,), jnp.float32)
    beta = jnp.zeros((Cout,), jnp.float32)
    mean = 0.05 * jnp.ones((Cout,), jnp.float32)
    var = 1.2 * jnp.ones((Cout,), jnp.float32)
    out_bn = jax.block_until_ready(conv_layer_forward(
        x, w, b, stride=1, padding=1, act="elt_wise",
        bn_params=(gamma, beta, mean, var, 1e-5)))
    y_bn = (y_ref - mean.reshape(1, -1, 1, 1)) * lax.rsqrt(
        var.reshape(1, -1, 1, 1) + 1e-5) * gamma.reshape(1, -1, 1, 1) \
        + beta.reshape(1, -1, 1, 1)
    ref_bn = jnp.maximum(y_bn[:, :Cout // 2], y_bn[:, Cout // 2:])
    assert jnp.allclose(out_bn, ref_bn, atol=1e-5, rtol=1e-5), "BN mismatch"

    # --- SliceMax: Pallas path, f32, 4D (repacked to aligned (R, L)) --------
    a_big = jax.random.normal(jax.random.PRNGKey(1), (2, 64, 56, 56), jnp.float32)
    r_big = jax.block_until_ready(slice_max(a_big, slice_point=2))
    assert jnp.array_equal(r_big, jnp.maximum(a_big[:, :32], a_big[:, 32:])), \
        "Pallas f32 4D mismatch"

    # --- SliceMax: Pallas path, bf16, 4D (dtype preserved) ------------------
    a_bf = jax.random.normal(jax.random.PRNGKey(2), (2, 64, 64, 64),
                             jnp.float32).astype(jnp.bfloat16)
    r_bf = jax.block_until_ready(slice_max(a_bf, slice_point=2))
    assert r_bf.dtype == jnp.bfloat16
    assert jnp.array_equal(r_bf, jnp.maximum(a_bf[:, :32], a_bf[:, 32:])), \
        "Pallas bf16 4D mismatch"

    # --- SliceMax: Pallas path, 2D FC-style input ----------------------------
    a_fc = jax.random.normal(jax.random.PRNGKey(3), (256, 2048), jnp.float32)
    r_fc = jax.block_until_ready(slice_max(a_fc, slice_point=2))
    assert jnp.array_equal(r_fc, jnp.maximum(a_fc[:, :1024], a_fc[:, 1024:])), \
        "Pallas 2D mismatch"

    # --- SliceMax: fallback paths (tiny 4D / tiny 2D / non-128-aligned) -----
    a4 = jax.random.normal(jax.random.PRNGKey(4), (2, 4, 16, 16), jnp.float32)
    assert jnp.array_equal(jax.block_until_ready(slice_max(a4)),
                           jnp.maximum(a4[:, :2], a4[:, 2:])), "tiny 4D mismatch"
    a2 = jax.random.normal(jax.random.PRNGKey(5), (8, 32), jnp.float32)
    assert jnp.array_equal(jax.block_until_ready(slice_max(a2)),
                           jnp.maximum(a2[:, :16], a2[:, 16:])), "tiny 2D mismatch"
    a_odd = jax.random.normal(jax.random.PRNGKey(6), (4, 128, 31, 31), jnp.float32)
    assert jnp.array_equal(jax.block_until_ready(slice_max(a_odd)),
                           jnp.maximum(a_odd[:, :64], a_odd[:, 64:])), \
        "non-aligned fallback mismatch"

    print("KERNEL_OK")
</pallas_src>

<mosaic_0001>
module attributes {stable_mosaic.version = 11 : i64} {
  func.func @_slicemax_kernel(%arg0: i32, %arg1: i32, %arg2: i32, %arg3: memref<1x2x49x2048xf32, #tpu.memory_space<vmem>>, %arg4: memref<1x49x2048xf32, #tpu.memory_space<vmem>>) attributes {dimension_semantics = [#tpu.dimension_semantics<parallel>, #tpu.dimension_semantics<parallel>, #tpu.dimension_semantics<parallel>], iteration_bounds = array<i64: 2, 1, 1>, scalar_prefetch = 0 : i64, scratch_operands = 0 : i64, tpu.core_type = #tpu.core_type<tc>, window_params = [{transform_indices = @transform_0, window_bounds = array<i64: 1, 2, 49, 2048>}, {transform_indices = @transform_1, window_bounds = array<i64: 1, 49, 2048>}]} {
    %c0 = arith.constant 0 : index
    %c0_0 = arith.constant 0 : index
    %c0_1 = arith.constant 0 : index
    %c0_2 = arith.constant 0 : index
    %0 = vector.load %arg3[%c0, %c0_0, %c0_1, %c0_2] : memref<1x2x49x2048xf32, #tpu.memory_space<vmem>>, vector<1x1x49x2048xf32>
    %1 = vector.shape_cast %0 : vector<1x1x49x2048xf32> to vector<1x49x2048xf32>
    %c0_3 = arith.constant 0 : index
    %c1 = arith.constant 1 : index
    %c0_4 = arith.constant 0 : index
    %c0_5 = arith.constant 0 : index
    %2 = vector.load %arg3[%c0_3, %c1, %c0_4, %c0_5] : memref<1x2x49x2048xf32, #tpu.memory_space<vmem>>, vector<1x1x49x2048xf32>
    %3 = vector.shape_cast %2 : vector<1x1x49x2048xf32> to vector<1x49x2048xf32>
    %4 = arith.maximumf %1, %3 : vector<1x49x2048xf32>
    %c0_6 = arith.constant 0 : index
    %c0_7 = arith.constant 0 : index
    %c0_8 = arith.constant 0 : index
    %5 = vector.load %arg4[%c0_6, %c0_7, %c0_8] : memref<1x49x2048xf32, #tpu.memory_space<vmem>>, vector<1x49x2048xf32>
    tpu.vector_store %arg4[%c0_6, %c0_7, %c0_8], %4 {strides = array<i32>} : memref<1x49x2048xf32, #tpu.memory_space<vmem>>, vector<1x49x2048xf32>,
    return
  }
  func.func @transform_0(%arg0: i32, %arg1: i32, %arg2: i32) -> (i32, i32, i32, i32) {
    %c0_i32 = arith.constant 0 : i32
    %c0_i32_0 = arith.constant 0 : i32
    return %arg0, %c0_i32, %arg1, %arg2 : i32, i32, i32, i32
  }
  func.func @transform_1(%arg0: i32, %arg1: i32, %arg2: i32) -> (i32, i32, i32) {
    %c0_i32 = arith.constant 0 : i32
    return %arg0, %arg1, %arg2 : i32, i32, i32
  }
}

</mosaic_0001>

<bundles_post_ra>
// kernel: tpu_custom_call.1
= control target key start
LH: loop header
LB: loop body
LE: loop exit
PB: predicated region body
PF: predicated region fallthrough
CT: control target
= control target key end

     0   :  { %s940_s6 = smov 0   ;;  %s942_s7 = smov 0   ;;  %s1313_s0 = inlined_call_operand.vmem [shape: f32[2,2,49,2048], index: 0, kind: input, shape index: {}]   ;;  %s1314_s1 = inlined_call_operand.vmem [shape: f32[2,49,2048], index: 1, kind: output, shape index: {}]  }
   0x1   :  { %s944_s8 = smov 0  }
   0x2 LB: > { %s30_s9 = sadd.s32 1, %s924_s7  ;;  %p763_p0 = scmp.ge.s32.totalorder %s928_s8, 1  ;;  %s928_s8 = sphi %s944_s8, %s11_s8   ;;  %s924_s7 = sphi %s942_s7, %s1316_s7   ;;  %s920_s6 = sphi %s940_s6, %s1315_s6  }
   0x3   : > { %p32_p1 = scmp.ge.s32.totalorder %s30_s9, 2  ;;  %p125_p2 = scmp.lt.s32.totalorder %s928_s8, 3 }
   0x5   : > { %s1318_s9 = smov (%p32_p1, %s30_s9), 0  ;;  %p126_p3 = pnand %p763_p0, %p125_p2 }
   0x6   : > { %p165_p4 = scmp.lt.s32.totalorder (!%p126_p3), %s920_s6, 1 }
   0x7   : > { %129 = sbr.rel (%p126_p3) target bundleno = 112 (0x70), region = 24 }
   0xe   : > { %s1320_s6 = smov (!%p165_p4, %s920_s6), 1 }
   0xf   : > { %s880_s10 = smul.u32 1792, %s1320_s6 }
  0x10   : > { %s881_s11 = smul.u32 896, %s1320_s6 }
  0x11   : > { %s961_s14 = scalar_lea.vmem %s1313_s0, %s880_s10 }
  0x12   : > { %s966_s17 = scalar_lea.vmem %s1314_s1, %s881_s11  ;;  %v195_v0 = vld [vmem:[%s961_s14] sm:$0xff]  ;;  %v196_v2 = vld [vmem:[%s961_s14 + $0x8] sm:$0xff]  ;;  %v197_v5 = vld [vmem:[%s961_s14 + $0x10] sm:$0xff] }
  0x13   : > { %v766_v1 = vld [vmem:[%s961_s14 + $0x380] sm:$0xff]  ;;  %v767_v4 = vld [vmem:[%s961_s14 + $0x388] sm:$0xff]  ;;  %v768_v6 = vld [vmem:[%s961_s14 + $0x390] sm:$0xff] }
  0x14   : > { %v420_v3 = vmax.f32 %v195_v0, %v766_v1  ;;  %v421_v7 = vmax.f32 %v196_v2, %v767_v4  ;;  %v422_v8 = vmax.f32 %v197_v5, %v768_v6  ;;  %v198_v9 = vld [vmem:[%s961_s14 + $0x18] sm:$0xff]  ;;  %v199_v11 = vld [vmem:[%s961_s14 + $0x20] sm:$0xff]  ;;  %v200_v14 = vld [vmem:[%s961_s14 + $0x28] sm:$0xff] }
  0x15   : > { %v769_v10 = vld [vmem:[%s961_s14 + $0x398] sm:$0xff]  ;;  %v770_v13 = vld [vmem:[%s961_s14 + $0x3a0] sm:$0xff]  ;;  %v771_v15 = vld [vmem:[%s961_s14 + $0x3a8] sm:$0xff] }
  0x16   : > { %532 = vst [vmem:[%s966_s17] sm:$0xff] %v420_v3  ;;  %v423_v12 = vmax.f32 %v198_v9, %v769_v10  ;;  %533 = vst [vmem:[%s966_s17 + $0x8] sm:$0xff] %v421_v7  ;;  %v424_v16 = vmax.f32 %v199_v11, %v770_v13  ;;  %v425_v17 = vmax.f32 %v200_v14, %v771_v15  ;;  %v201_v18 = vld [vmem:[%s961_s14 + $0x30] sm:$0xff]  ;;  %v202_v20 = vld [vmem:[%s961_s14 + $0x38] sm:$0xff] }
  0x17   : > { %534 = vst [vmem:[%s966_s17 + $0x10] sm:$0xff] %v422_v8  ;;  %v772_v19 = vld [vmem:[%s961_s14 + $0x3b0] sm:$0xff]  ;;  %v773_v22 = vld [vmem:[%s961_s14 + $0x3b8] sm:$0xff]  ;;  %v203_v23 = vld [vmem:[%s961_s14 + $0x40] sm:$0xff] }
  0x18   : > { %535 = vst [vmem:[%s966_s17 + $0x18] sm:$0xff] %v423_v12  ;;  %v426_v21 = vmax.f32 %v201_v18, %v772_v19  ;;  %v774_v24 = vld [vmem:[%s961_s14 + $0x3c0] sm:$0xff]  ;;  %536 = vst [vmem:[%s966_s17 + $0x20] sm:$0xff] %v424_v16  ;;  %v427_v25 = vmax.f32 %v202_v20, %v773_v22  ;;  %v204_v27 = vld [vmem:[%s961_s14 + $0x48] sm:$0xff] }
  0x19   : > { %537 = vst [vmem:[%s966_s17 + $0x28] sm:$0xff] %v425_v17  ;;  %v428_v26 = vmax.f32 %v203_v23, %v774_v24  ;;  %v775_v28 = vld [vmem:[%s961_s14 + $0x3c8] sm:$0xff]  ;;  %v205_v29 = vld [vmem:[%s961_s14 + $0x50] sm:$0xff]  ;;  %v206_v32 = vld [vmem:[%s961_s14 + $0x58] sm:$0xff] }
  0x1a   : > { %538 = vst [vmem:[%s966_s17 + $0x30] sm:$0xff] %v426_v21  ;;  %v429_v30 = vmax.f32 %v204_v27, %v775_v28  ;;  %v776_v31 = vld [vmem:[%s961_s14 + $0x3d0] sm:$0xff]  ;;  %v777_v33 = vld [vmem:[%s961_s14 + $0x3d8] sm:$0xff]  ;;  %539 = vst [vmem:[%s966_s17 + $0x38] sm:$0xff] %v427_v25 }
  0x1b   : > { %540 = vst [vmem:[%s966_s17 + $0x40] sm:$0xff] %v428_v26  ;;  %v430_v34 = vmax.f32 %v205_v29, %v776_v31  ;;  %v431_v35 = vmax.f32 %v206_v32, %v777_v33  ;;  %v207_v36 = vld [vmem:[%s961_s14 + $0x60] sm:$0xff]  ;;  %v208_v38 = vld [vmem:[%s961_s14 + $0x68] sm:$0xff]  ;;  %v209_v41 = vld [vmem:[%s961_s14 + $0x70] sm:$0xff] }
  0x1c   : > { %v778_v37 = vld [vmem:[%s961_s14 + $0x3e0] sm:$0xff]  ;;  %541 = vst [vmem:[%s966_s17 + $0x48] sm:$0xff] %v429_v30  ;;  %v779_v40 = vld [vmem:[%s961_s14 + $0x3e8] sm:$0xff]  ;;  %v780_v42 = vld [vmem:[%s961_s14 + $0x3f0] sm:$0xff] }
  0x1d   : > { %v432_v39 = vmax.f32 %v207_v36, %v778_v37  ;;  %542 = vst [vmem:[%s966_s17 + $0x50] sm:$0xff] %v430_v34  ;;  %543 = vst [vmem:[%s966_s17 + $0x58] sm:$0xff] %v431_v35  ;;  %v433_v43 = vmax.f32 %v208_v38, %v779_v40  ;;  %v434_v44 = vmax.f32 %v209_v41, %v780_v42  ;;  %v210_v45 = vld [vmem:[%s961_s14 + $0x78] sm:$0xff]  ;;  %v211_v47 = vld [vmem:[%s961_s14 + $0x80] sm:$0xff] }
  0x1e   : > { %v781_v46 = vld [vmem:[%s961_s14 + $0x3f8] sm:$0xff]  ;;  %v782_v49 = vld [vmem:[%s961_s14 + $0x400] sm:$0xff]  ;;  %v212_v50 = vld [vmem:[%s961_s14 + $0x88] sm:$0xff] }
  0x1f   : > { %544 = vst [vmem:[%s966_s17 + $0x60] sm:$0xff] %v432_v39  ;;  %v435_v48 = vmax.f32 %v210_v45, %v781_v46  ;;  %v783_v51 = vld [vmem:[%s961_s14 + $0x408] sm:$0xff]  ;;  %545 = vst [vmem:[%s966_s17 + $0x68] sm:$0xff] %v433_v43  ;;  %v436_v52 = vmax.f32 %v211_v47, %v782_v49  ;;  %v213_v54 = vld [vmem:[%s961_s14 + $0x90] sm:$0xff] }
  0x20   : > { %546 = vst [vmem:[%s966_s17 + $0x70] sm:$0xff] %v434_v44  ;;  %v437_v53 = vmax.f32 %v212_v50, %v783_v51  ;;  %v784_v55 = vld [vmem:[%s961_s14 + $0x410] sm:$0xff]  ;;  %v214_v56 = vld [vmem:[%s961_s14 + $0x98] sm:$0xff]  ;;  %v215_v59 = vld [vmem:[%s961_s14 + $0xa0] sm:$0xff] }
  0x21   : > { %547 = vst [vmem:[%s966_s17 + $0x78] sm:$0xff] %v435_v48  ;;  %v438_v57 = vmax.f32 %v213_v54, %v784_v55  ;;  %v785_v58 = vld [vmem:[%s961_s14 + $0x418] sm:$0xff]  ;;  %v786_v60 = vld [vmem:[%s961_s14 + $0x420] sm:$0xff]  ;;  %548 = vst [vmem:[%s966_s17 + $0x80] sm:$0xff] %v436_v52 }
  0x22   : > { %549 = vst [vmem:[%s966_s17 + $0x88] sm:$0xff] %v437_v53  ;;  %v439_v61 = vmax.f32 %v214_v56, %v785_v58  ;;  %v440_v62 = vmax.f32 %v215_v59, %v786_v60  ;;  %v216_v63 = vld [vmem:[%s961_s14 + $0xa8] sm:$0xff]  ;;  %v217_v1 = vld [vmem:[%s961_s14 + $0xb0] sm:$0xff]  ;;  %v218_v4 = vld [vmem:[%s961_s14 + $0xb8] sm:$0xff] }
  0x23   : > { %v787_v0 = vld [vmem:[%s961_s14 + $0x428] sm:$0xff]  ;;  %550 = vst [vmem:[%s966_s17 + $0x90] sm:$0xff] %v438_v57  ;;  %v788_v3 = vld [vmem:[%s961_s14 + $0x430] sm:$0xff]  ;;  %v789_v5 = vld [vmem:[%s961_s14 + $0x438] sm:$0xff] }
  0x24   : > { %v441_v2 = vmax.f32 %v216_v63, %v787_v0  ;;  %551 = vst [vmem:[%s966_s17 + $0x98] sm:$0xff] %v439_v61  ;;  %552 = vst [vmem:[%s966_s17 + $0xa0] sm:$0xff] %v440_v62  ;;  %v442_v6 = vmax.f32 %v217_v1, %v788_v3  ;;  %v443_v7 = vmax.f32 %v218_v4, %v789_v5  ;;  %v219_v8 = vld [vmem:[%s961_s14 + $0xc0] sm:$0xff]  ;;  %v220_v10 = vld [vmem:[%s961_s14 + $0xc8] sm:$0xff] }
  0x25   : > { %v790_v9 = vld [vmem:[%s961_s14 + $0x440] sm:$0xff]  ;;  %v791_v12 = vld [vmem:[%s961_s14 + $0x448] sm:$0xff]  ;;  %v221_v13 = vld [vmem:[%s961_s14 + $0xd0] sm:$0xff] }
  0x26   : > { %553 = vst [vmem:[%s966_s17 + $0xa8] sm:$0xff] %v441_v2  ;;  %v444_v11 = vmax.f32 %v219_v8, %v790_v9  ;;  %v792_v14 = vld [vmem:[%s961_s14 + $0x450] sm:$0xff]  ;;  %554 = vst [vmem:[%s966_s17 + $0xb0] sm:$0xff] %v442_v6  ;;  %v445_v15 = vmax.f32 %v220_v10, %v791_v12  ;;  %v222_v17 = vld [vmem:[%s961_s14 + $0xd8] sm:$0xff] }
  0x27   : > { %555 = vst [vmem:[%s966_s17 + $0xb8] sm:$0xff] %v443_v7  ;;  %v446_v16 = vmax.f32 %v221_v13, %v792_v14  ;;  %v793_v18 = vld [vmem:[%s961_s14 + $0x458] sm:$0xff]  ;;  %v223_v19 = vld [vmem:[%s961_s14 + $0xe0] sm:$0xff]  ;;  %v224_v22 = vld [vmem:[%s961_s14 + $0xe8] sm:$0xff] }
  0x28   : > { %556 = vst [vmem:[%s966_s17 + $0xc0] sm:$0xff] %v444_v11  ;;  %v447_v20 = vmax.f32 %v222_v17, %v793_v18  ;;  %v794_v21 = vld [vmem:[%s961_s14 + $0x460] sm:$0xff]  ;;  %v795_v23 = vld [vmem:[%s961_s14 + $0x468] sm:$0xff]  ;;  %557 = vst [vmem:[%s966_s17 + $0xc8] sm:$0xff] %v445_v15 }
  0x29   : > { %558 = vst [vmem:[%s966_s17 + $0xd0] sm:$0xff] %v446_v16  ;;  %v448_v24 = vmax.f32 %v223_v19, %v794_v21  ;;  %v449_v25 = vmax.f32 %v224_v22, %v795_v23  ;;  %v225_v26 = vld [vmem:[%s961_s14 + $0xf0] sm:$0xff]  ;;  %v226_v28 = vld [vmem:[%s961_s14 + $0xf8] sm:$0xff]  ;;  %v227_v31 = vld [vmem:[%s961_s14 + $0x100] sm:$0xff] }
  0x2a   : > { %v796_v27 = vld [vmem:[%s961_s14 + $0x470] sm:$0xff]  ;;  %559 = vst [vmem:[%s966_s17 + $0xd8] sm:$0xff] %v447_v20  ;;  %v797_v30 = vld [vmem:[%s961_s14 + $0x478] sm:$0xff]  ;;  %v798_v32 = vld [vmem:[%s961_s14 + $0x480] sm:$0xff] }
  0x2b   : > { %v450_v29 = vmax.f32 %v225_v26, %v796_v27  ;;  %560 = vst [vmem:[%s966_s17 + $0xe0] sm:$0xff] %v448_v24  ;;  %561 = vst [vmem:[%s966_s17 + $0xe8] sm:$0xff] %v449_v25  ;;  %v451_v33 = vmax.f32 %v226_v28, %v797_v30  ;;  %v452_v34 = vmax.f32 %v227_v31, %v798_v32  ;;  %v228_v35 = vld [vmem:[%s961_s14 + $0x108] sm:$0xff]  ;;  %v229_v37 = vld [vmem:[%s961_s14 + $0x110] sm:$0xff] }
  0x2c   : > { %v799_v36 = vld [vmem:[%s961_s14 + $0x488] sm:$0xff]  ;;  %v800_v39 = vld [vmem:[%s961_s14 + $0x490] sm:$0xff]  ;;  %v230_v40 = vld [vmem:[%s961_s14 + $0x118] sm:$0xff] }
  0x2d   : > { %562 = vst [vmem:[%s966_s17 + $0xf0] sm:$0xff] %v450_v29  ;;  %v453_v38 = vmax.f32 %v228_v35, %v799_v36  ;;  %v801_v41 = vld [vmem:[%s961_s14 + $0x498] sm:$0xff]  ;;  %563 = vst [vmem:[%s966_s17 + $0xf8] sm:$0xff] %v451_v33  ;;  %v454_v42 = vmax.f32 %v229_v37, %v800_v39  ;;  %v231_v44 = vld [vmem:[%s961_s14 + $0x120] sm:$0xff] }
  0x2e   : > { %564 = vst [vmem:[%s966_s17 + $0x100] sm:$0xff] %v452_v34  ;;  %v455_v43 = vmax.f32 %v230_v40, %v801_v41  ;;  %v802_v45 = vld [vmem:[%s961_s14 + $0x4a0] sm:$0xff]  ;;  %v232_v46 = vld [vmem:[%s961_s14 + $0x128] sm:$0xff]  ;;  %v233_v49 = vld [vmem:[%s961_s14 + $0x130] sm:$0xff] }
  0x2f   : > { %565 = vst [vmem:[%s966_s17 + $0x108] sm:$0xff] %v453_v38  ;;  %v456_v47 = vmax.f32 %v231_v44, %v802_v45  ;;  %v803_v48 = vld [vmem:[%s961_s14 + $0x4a8] sm:$0xff]  ;;  %v804_v50 = vld [vmem:[%s961_s14 + $0x4b0] sm:$0xff]  ;;  %566 = vst [vmem:[%s966_s17 + $0x110] sm:$0xff] %v454_v42 }
  0x30   : > { %567 = vst [vmem:[%s966_s17 + $0x118] sm:$0xff] %v455_v43  ;;  %v457_v51 = vmax.f32 %v232_v46, %v803_v48  ;;  %v458_v52 = vmax.f32 %v233_v49, %v804_v50  ;;  %v234_v53 = vld [vmem:[%s961_s14 + $0x138] sm:$0xff]  ;;  %v235_v55 = vld [vmem:[%s961_s14 + $0x140] sm:$0xff]  ;;  %v236_v58 = vld [vmem:[%s961_s14 + $0x148] sm:$0xff] }
  0x31   : > { %v805_v54 = vld [vmem:[%s961_s14 + $0x4b8] sm:$0xff]  ;;  %568 = vst [vmem:[%s966_s17 + $0x120] sm:$0xff] %v456_v47  ;;  %v806_v57 = vld [vmem:[%s961_s14 + $0x4c0] sm:$0xff]  ;;  %v807_v59 = vld [vmem:[%s961_s14 + $0x4c8] sm:$0xff] }
  0x32   : > { %v459_v56 = vmax.f32 %v234_v53, %v805_v54  ;;  %569 = vst [vmem:[%s966_s17 + $0x128] sm:$0xff] %v457_v51  ;;  %570 = vst [vmem:[%s966_s17 + $0x130] sm:$0xff] %v458_v52  ;;  %v460_v60 = vmax.f32 %v235_v55, %v806_v57  ;;  %v461_v61 = vmax.f32 %v236_v58, %v807_v59  ;;  %v237_v62 = vld [vmem:[%s961_s14 + $0x150] sm:$0xff]  ;;  %v238_v0 = vld [vmem:[%s961_s14 + $0x158] sm:$0xff] }
  0x33   : > { %v808_v63 = vld [vmem:[%s961_s14 + $0x4d0] sm:$0xff]  ;;  %v809_v2 = vld [vmem:[%s961_s14 + $0x4d8] sm:$0xff]  ;;  %v239_v3 = vld [vmem:[%s961_s14 + $0x160] sm:$0xff] }
  0x34   : > { %571 = vst [vmem:[%s966_s17 + $0x138] sm:$0xff] %v459_v56  ;;  %v462_v1 = vmax.f32 %v237_v62, %v808_v63  ;;  %v810_v4 = vld [vmem:[%s961_s14 + $0x4e0] sm:$0xff]  ;;  %572 = vst [vmem:[%s966_s17 + $0x140] sm:$0xff] %v460_v60  ;;  %v463_v5 = vmax.f32 %v238_v0, %v809_v2  ;;  %v240_v7 = vld [vmem:[%s961_s14 + $0x168] sm:$0xff] }
  0x35   : > { %573 = vst [vmem:[%s966_s17 + $0x148] sm:$0xff] %v461_v61  ;;  %v464_v6 = vmax.f32 %v239_v3, %v810_v4  ;;  %v811_v8 = vld [vmem:[%s961_s14 + $0x4e8] sm:$0xff]  ;;  %v241_v9 = vld [vmem:[%s961_s14 + $0x170] sm:$0xff]  ;;  %v242_v12 = vld [vmem:[%s961_s14 + $0x178] sm:$0xff] }
  0x36   : > { %574 = vst [vmem:[%s966_s17 + $0x150] sm:$0xff] %v462_v1  ;;  %v465_v10 = vmax.f32 %v240_v7, %v811_v8  ;;  %v812_v11 = vld [vmem:[%s961_s14 + $0x4f0] sm:$0xff]  ;;  %v813_v13 = vld [vmem:[%s961_s14 + $0x4f8] sm:$0xff]  ;;  %575 = vst [vmem:[%s966_s17 + $0x158] sm:$0xff] %v463_v5 }
  0x37   : > { %576 = vst [vmem:[%s966_s17 + $0x160] sm:$0xff] %v464_v6  ;;  %v466_v14 = vmax.f32 %v241_v9, %v812_v11  ;;  %v467_v15 = vmax.f32 %v242_v12, %v813_v13  ;;  %v243_v16 = vld [vmem:[%s961_s14 + $0x180] sm:$0xff]  ;;  %v244_v18 = vld [vmem:[%s961_s14 + $0x188] sm:$0xff]  ;;  %v245_v21 = vld [vmem:[%s961_s14 + $0x190] sm:$0xff] }
  0x38   : > { %v814_v17 = vld [vmem:[%s961_s14 + $0x500] sm:$0xff]  ;;  %577 = vst [vmem:[%s966_s17 + $0x168] sm:$0xff] %v465_v10  ;;  %v815_v20 = vld [vmem:[%s961_s14 + $0x508] sm:$0xff]  ;;  %v816_v22 = vld [vmem:[%s961_s14 + $0x510] sm:$0xff] }
  0x39   : > { %v468_v19 = vmax.f32 %v243_v16, %v814_v17  ;;  %578 = vst [vmem:[%s966_s17 + $0x170] sm:$0xff] %v466_v14  ;;  %579 = vst [vmem:[%s966_s17 + $0x178] sm:$0xff] %v467_v15  ;;  %v469_v23 = vmax.f32 %v244_v18, %v815_v20  ;;  %v470_v24 = vmax.f32 %v245_v21, %v816_v22  ;;  %v246_v25 = vld [vmem:[%s961_s14 + $0x198] sm:$0xff]  ;;  %v247_v27 = vld [vmem:[%s961_s14 + $0x1a0] sm:$0xff] }
  0x3a   : > { %v817_v26 = vld [vmem:[%s961_s14 + $0x518] sm:$0xff]  ;;  %v818_v29 = vld [vmem:[%s961_s14 + $0x520] sm:$0xff]  ;;  %v248_v30 = vld [vmem:[%s961_s14 + $0x1a8] sm:$0xff] }
  0x3b   : > { %580 = vst [vmem:[%s966_s17 + $0x180] sm:$0xff] %v468_v19  ;;  %v471_v28 = vmax.f32 %v246_v25, %v817_v26  ;;  %v819_v31 = vld [vmem:[%s961_s14 + $0x528] sm:$0xff]  ;;  %581 = vst [vmem:[%s966_s17 + $0x188] sm:$0xff] %v469_v23  ;;  %v472_v32 = vmax.f32 %v247_v27, %v818_v29  ;;  %v249_v34 = vld [vmem:[%s961_s14 + $0x1b0] sm:$0xff] }
  0x3c   : > { %582 = vst [vmem:[%s966_s17 + $0x190] sm:$0xff] %v470_v24  ;;  %v473_v33 = vmax.f32 %v248_v30, %v819_v31  ;;  %v820_v35 = vld [vmem:[%s961_s14 + $0x530] sm:$0xff]  ;;  %v250_v36 = vld [vmem:[%s961_s14 + $0x1b8] sm:$0xff]  ;;  %v251_v39 = vld [vmem:[%s961_s14 + $0x1c0] sm:$0xff] }
  0x3d   : > { %583 = vst [vmem:[%s966_s17 + $0x198] sm:$0xff] %v471_v28  ;;  %v474_v37 = vmax.f32 %v249_v34, %v820_v35  ;;  %v821_v38 = vld [vmem:[%s961_s14 + $0x538] sm:$0xff]  ;;  %v822_v40 = vld [vmem:[%s961_s14 + $0x540] sm:$0xff]  ;;  %584 = vst [vmem:[%s966_s17 + $0x1a0] sm:$0xff] %v472_v32 }
  0x3e   : > { %585 = vst [vmem:[%s966_s17 + $0x1a8] sm:$0xff] %v473_v33  ;;  %v475_v41 = vmax.f32 %v250_v36, %v821_v38  ;;  %v476_v42 = vmax.f32 %v251_v39, %v822_v40  ;;  %v252_v43 = vld [vmem:[%s961_s14 + $0x1c8] sm:$0xff]  ;;  %v253_v45 = vld [vmem:[%s961_s14 + $0x1d0] sm:$0xff]  ;;  %v254_v48 = vld [vmem:[%s961_s14 + $0x1d8] sm:$0xff] }
  0x3f   : > { %v823_v44 = vld [vmem:[%s961_s14 + $0x548] sm:$0xff]  ;;  %586 = vst [vmem:[%s966_s17 + $0x1b0] sm:$0xff] %v474_v37  ;;  %v824_v47 = vld [vmem:[%s961_s14 + $0x550] sm:$0xff]  ;;  %v825_v49 = vld [vmem:[%s961_s14 + $0x558] sm:$0xff] }
  0x40   : > { %v477_v46 = vmax.f32 %v252_v43, %v823_v44  ;;  %587 = vst [vmem:[%s966_s17 + $0x1b8] sm:$0xff] %v475_v41  ;;  %588 = vst [vmem:[%s966_s17 + $0x1c0] sm:$0xff] %v476_v42  ;;  %v478_v50 = vmax.f32 %v253_v45, %v824_v47  ;;  %v479_v51 = vmax.f32 %v254_v48, %v825_v49  ;;  %v255_v52 = vld [vmem:[%s961_s14 + $0x1e0] sm:$0xff]  ;;  %v256_v54 = vld [vmem:[%s961_s14 + $0x1e8] sm:$0xff] }
  0x41   : > { %v826_v53 = vld [vmem:[%s961_s14 + $0x560] sm:$0xff]  ;;  %v827_v56 = vld [vmem:[%s961_s14 + $0x568] sm:$0xff]  ;;  %v257_v57 = vld [vmem:[%s961_s14 + $0x1f0] sm:$0xff] }
  0x42   : > { %589 = vst [vmem:[%s966_s17 + $0x1c8] sm:$0xff] %v477_v46  ;;  %v480_v55 = vmax.f32 %v255_v52, %v826_v53  ;;  %v828_v58 = vld [vmem:[%s961_s14 + $0x570] sm:$0xff]  ;;  %590 = vst [vmem:[%s966_s17 + $0x1d0] sm:$0xff] %v478_v50  ;;  %v481_v59 = vmax.f32 %v256_v54, %v827_v56  ;;  %v258_v61 = vld [vmem:[%s961_s14 + $0x1f8] sm:$0xff] }
  0x43   : > { %591 = vst [vmem:[%s966_s17 + $0x1d8] sm:$0xff] %v479_v51  ;;  %v482_v60 = vmax.f32 %v257_v57, %v828_v58  ;;  %v829_v62 = vld [vmem:[%s961_s14 + $0x578] sm:$0xff]  ;;  %v259_v63 = vld [vmem:[%s961_s14 + $0x200] sm:$0xff]  ;;  %v260_v2 = vld [vmem:[%s961_s14 + $0x208] sm:$0xff] }
  0x44   : > { %592 = vst [vmem:[%s966_s17 + $0x1e0] sm:$0xff] %v480_v55  ;;  %v483_v0 = vmax.f32 %v258_v61, %v829_v62  ;;  %v830_v1 = vld [vmem:[%s961_s14 + $0x580] sm:$0xff]  ;;  %v831_v3 = vld [vmem:[%s961_s14 + $0x588] sm:$0xff]  ;;  %593 = vst [vmem:[%s966_s17 + $0x1e8] sm:$0xff] %v481_v59 }
  0x45   : > { %594 = vst [vmem:[%s966_s17 + $0x1f0] sm:$0xff] %v482_v60  ;;  %v484_v4 = vmax.f32 %v259_v63, %v830_v1  ;;  %v485_v5 = vmax.f32 %v260_v2, %v831_v3  ;;  %v261_v6 = vld [vmem:[%s961_s14 + $0x210] sm:$0xff]  ;;  %v262_v8 = vld [vmem:[%s961_s14 + $0x218] sm:$0xff]  ;;  %v263_v11 = vld [vmem:[%s961_s14 + $0x220] sm:$0xff] }
  0x46   : > { %v832_v7 = vld [vmem:[%s961_s14 + $0x590] sm:$0xff]  ;;  %595 = vst [vmem:[%s966_s17 + $0x1f8] sm:$0xff] %v483_v0  ;;  %v833_v10 = vld [vmem:[%s961_s14 + $0x598] sm:$0xff]  ;;  %v834_v12 = vld [vmem:[%s961_s14 + $0x5a0] sm:$0xff] }
  0x47   : > { %v486_v9 = vmax.f32 %v261_v6, %v832_v7  ;;  %596 = vst [vmem:[%s966_s17 + $0x200] sm:$0xff] %v484_v4  ;;  %597 = vst [vmem:[%s966_s17 + $0x208] sm:$0xff] %v485_v5  ;;  %v487_v13 = vmax.f32 %v262_v8, %v833_v10  ;;  %v488_v14 = vmax.f32 %v263_v11, %v834_v12  ;;  %v264_v15 = vld [vmem:[%s961_s14 + $0x228] sm:$0xff]  ;;  %v265_v17 = vld [vmem:[%s961_s14 + $0x230] sm:$0xff] }
  0x48   : > { %v835_v16 = vld [vmem:[%s961_s14 + $0x5a8] sm:$0xff]  ;;  %v836_v19 = vld [vmem:[%s961_s14 + $0x5b0] sm:$0xff]  ;;  %v266_v20 = vld [vmem:[%s961_s14 + $0x238] sm:$0xff] }
  0x49   : > { %598 = vst [vmem:[%s966_s17 + $0x210] sm:$0xff] %v486_v9  ;;  %v489_v18 = vmax.f32 %v264_v15, %v835_v16  ;;  %v837_v21 = vld [vmem:[%s961_s14 + $0x5b8] sm:$0xff]  ;;  %599 = vst [vmem:[%s966_s17 + $0x218] sm:$0xff] %v487_v13  ;;  %v490_v22 = vmax.f32 %v265_v17, %v836_v19  ;;  %v267_v24 = vld [vmem:[%s961_s14 + $0x240] sm:$0xff] }
  0x4a   : > { %600 = vst [vmem:[%s966_s17 + $0x220] sm:$0xff] %v488_v14  ;;  %v491_v23 = vmax.f32 %v266_v20, %v837_v21  ;;  %v838_v25 = vld [vmem:[%s961_s14 + $0x5c0] sm:$0xff]  ;;  %v268_v26 = vld [vmem:[%s961_s14 + $0x248] sm:$0xff]  ;;  %v269_v29 = vld [vmem:[%s961_s14 + $0x250] sm:$0xff] }
  0x4b   : > { %601 = vst [vmem:[%s966_s17 + $0x228] sm:$0xff] %v489_v18  ;;  %v492_v27 = vmax.f32 %v267_v24, %v838_v25  ;;  %v839_v28 = vld [vmem:[%s961_s14 + $0x5c8] sm:$0xff]  ;;  %v840_v30 = vld [vmem:[%s961_s14 + $0x5d0] sm:$0xff]  ;;  %602 = vst [vmem:[%s966_s17 + $0x230] sm:$0xff] %v490_v22 }
  0x4c   : > { %603 = vst [vmem:[%s966_s17 + $0x238] sm:$0xff] %v491_v23  ;;  %v493_v31 = vmax.f32 %v268_v26, %v839_v28  ;;  %v494_v32 = vmax.f32 %v269_v29, %v840_v30  ;;  %v270_v33 = vld [vmem:[%s961_s14 + $0x258] sm:$0xff]  ;;  %v271_v35 = vld [vmem:[%s961_s14 + $0x260] sm:$0xff]  ;;  %v272_v38 = vld [vmem:[%s961_s14 + $0x268] sm:$0xff] }
  0x4d   : > { %v841_v34 = vld [vmem:[%s961_s14 + $0x5d8] sm:$0xff]  ;;  %604 = vst [vmem:[%s966_s17 + $0x240] sm:$0xff] %v492_v27  ;;  %v842_v37 = vld [vmem:[%s961_s14 + $0x5e0] sm:$0xff]  ;;  %v843_v39 = vld [vmem:[%s961_s14 + $0x5e8] sm:$0xff] }
  0x4e   : > { %v495_v36 = vmax.f32 %v270_v33, %v841_v34  ;;  %605 = vst [vmem:[%s966_s17 + $0x248] sm:$0xff] %v493_v31  ;;  %606 = vst [vmem:[%s966_s17 + $0x250] sm:$0xff] %v494_v32  ;;  %v496_v40 = vmax.f32 %v271_v35, %v842_v37  ;;  %v497_v41 = vmax.f32 %v272_v38, %v843_v39  ;;  %v273_v42 = vld [vmem:[%s961_s14 + $0x270] sm:$0xff]  ;;  %v274_v44 = vld [vmem:[%s961_s14 + $0x278] sm:$0xff] }
  0x4f   : > { %v844_v43 = vld [vmem:[%s961_s14 + $0x5f0] sm:$0xff]  ;;  %v845_v46 = vld [vmem:[%s961_s14 + $0x5f8] sm:$0xff]  ;;  %v275_v47 = vld [vmem:[%s961_s14 + $0x280] sm:$0xff] }
  0x50   : > { %607 = vst [vmem:[%s966_s17 + $0x258] sm:$0xff] %v495_v36  ;;  %v498_v45 = vmax.f32 %v273_v42, %v844_v43  ;;  %v846_v48 = vld [vmem:[%s961_s14 + $0x600] sm:$0xff]  ;;  %608 = vst [vmem:[%s966_s17 + $0x260] sm:$0xff] %v496_v40  ;;  %v499_v49 = vmax.f32 %v274_v44, %v845_v46  ;;  %v276_v51 = vld [vmem:[%s961_s14 + $0x288] sm:$0xff] }
  0x51   : > { %609 = vst [vmem:[%s966_s17 + $0x268] sm:$0xff] %v497_v41  ;;  %v500_v50 = vmax.f32 %v275_v47, %v846_v48  ;;  %v847_v52 = vld [vmem:[%s961_s14 + $0x608] sm:$0xff]  ;;  %v277_v53 = vld [vmem:[%s961_s14 + $0x290] sm:$0xff]  ;;  %v278_v56 = vld [vmem:[%s961_s14 + $0x298] sm:$0xff] }
  0x52   : > { %610 = vst [vmem:[%s966_s17 + $0x270] sm:$0xff] %v498_v45  ;;  %v501_v54 = vmax.f32 %v276_v51, %v847_v52  ;;  %v848_v55 = vld [vmem:[%s961_s14 + $0x610] sm:$0xff]  ;;  %v849_v57 = vld [vmem:[%s961_s14 + $0x618] sm:$0xff]  ;;  %611 = vst [vmem:[%s966_s17 + $0x278] sm:$0xff] %v499_v49 }
  0x53   : > { %612 = vst [vmem:[%s966_s17 + $0x280] sm:$0xff] %v500_v50  ;;  %v502_v58 = vmax.f32 %v277_v53, %v848_v55  ;;  %v503_v59 = vmax.f32 %v278_v56, %v849_v57  ;;  %v279_v60 = vld [vmem:[%s961_s14 + $0x2a0] sm:$0xff]  ;;  %v280_v62 = vld [vmem:[%s961_s14 + $0x2a8] sm:$0xff]  ;;  %v281_v1 = vld [vmem:[%s961_s14 + $0x2b0] sm:$0xff] }
  0x54   : > { %v850_v61 = vld [vmem:[%s961_s14 + $0x620] sm:$0xff]  ;;  %613 = vst [vmem:[%s966_s17 + $0x288] sm:$0xff] %v501_v54  ;;  %v851_v0 = vld [vmem:[%s961_s14 + $0x628] sm:$0xff]  ;;  %v852_v2 = vld [vmem:[%s961_s14 + $0x630] sm:$0xff] }
  0x55   : > { %v504_v63 = vmax.f32 %v279_v60, %v850_v61  ;;  %614 = vst [vmem:[%s966_s17 + $0x290] sm:$0xff] %v502_v58  ;;  %615 = vst [vmem:[%s966_s17 + $0x298] sm:$0xff] %v503_v59  ;;  %v505_v3 = vmax.f32 %v280_v62, %v851_v0  ;;  %v506_v4 = vmax.f32 %v281_v1, %v852_v2  ;;  %v282_v5 = vld [vmem:[%s961_s14 + $0x2b8] sm:$0xff]  ;;  %v283_v7 = vld [vmem:[%s961_s14 + $0x2c0] sm:$0xff] }
  0x56   : > { %v853_v6 = vld [vmem:[%s961_s14 + $0x638] sm:$0xff]  ;;  %v854_v9 = vld [vmem:[%s961_s14 + $0x640] sm:$0xff]  ;;  %v284_v10 = vld [vmem:[%s961_s14 + $0x2c8] sm:$0xff] }
  0x57   : > { %616 = vst [vmem:[%s966_s17 + $0x2a0] sm:$0xff] %v504_v63  ;;  %v507_v8 = vmax.f32 %v282_v5, %v853_v6  ;;  %v855_v11 = vld [vmem:[%s961_s14 + $0x648] sm:$0xff]  ;;  %617 = vst [vmem:[%s966_s17 + $0x2a8] sm:$0xff] %v505_v3  ;;  %v508_v12 = vmax.f32 %v283_v7, %v854_v9  ;;  %v285_v14 = vld [vmem:[%s961_s14 + $0x2d0] sm:$0xff] }
  0x58   : > { %618 = vst [vmem:[%s966_s17 + $0x2b0] sm:$0xff] %v506_v4  ;;  %v509_v13 = vmax.f32 %v284_v10, %v855_v11  ;;  %v856_v15 = vld [vmem:[%s961_s14 + $0x650] sm:$0xff]  ;;  %v286_v16 = vld [vmem:[%s961_s14 + $0x2d8] sm:$0xff]  ;;  %v287_v19 = vld [vmem:[%s961_s14 + $0x2e0] sm:$0xff] }
  0x59   : > { %619 = vst [vmem:[%s966_s17 + $0x2b8] sm:$0xff] %v507_v8  ;;  %v510_v17 = vmax.f32 %v285_v14, %v856_v15  ;;  %v857_v18 = vld [vmem:[%s961_s14 + $0x658] sm:$0xff]  ;;  %v858_v20 = vld [vmem:[%s961_s14 + $0x660] sm:$0xff]  ;;  %620 = vst [vmem:[%s966_s17 + $0x2c0] sm:$0xff] %v508_v12 }
  0x5a   : > { %621 = vst [vmem:[%s966_s17 + $0x2c8] sm:$0xff] %v509_v13  ;;  %v511_v21 = vmax.f32 %v286_v16, %v857_v18  ;;  %v512_v22 = vmax.f32 %v287_v19, %v858_v20  ;;  %v288_v23 = vld [vmem:[%s961_s14 + $0x2e8] sm:$0xff]  ;;  %v289_v25 = vld [vmem:[%s961_s14 + $0x2f0] sm:$0xff]  ;;  %v290_v28 = vld [vmem:[%s961_s14 + $0x2f8] sm:$0xff] }
  0x5b   : > { %v859_v24 = vld [vmem:[%s961_s14 + $0x668] sm:$0xff]  ;;  %622 = vst [vmem:[%s966_s17 + $0x2d0] sm:$0xff] %v510_v17  ;;  %v860_v27 = vld [vmem:[%s961_s14 + $0x670] sm:$0xff]  ;;  %v861_v29 = vld [vmem:[%s961_s14 + $0x678] sm:$0xff] }
  0x5c   : > { %v513_v26 = vmax.f32 %v288_v23, %v859_v24  ;;  %623 = vst [vmem:[%s966_s17 + $0x2d8] sm:$0xff] %v511_v21  ;;  %624 = vst [vmem:[%s966_s17 + $0x2e0] sm:$0xff] %v512_v22  ;;  %v514_v30 = vmax.f32 %v289_v25, %v860_v27  ;;  %v515_v31 = vmax.f32 %v290_v28, %v861_v29  ;;  %v291_v32 = vld [vmem:[%s961_s14 + $0x300] sm:$0x1]  ;;  %v292_v34 = vld [vmem:[%s961_s14 + $0x308] sm:$0x1] }
  0x5d   : > { %v862_v33 = vld [vmem:[%s961_s14 + $0x680] sm:$0x1]  ;;  %v863_v36 = vld [vmem:[%s961_s14 + $0x688] sm:$0x1]  ;;  %v293_v37 = vld [vmem:[%s961_s14 + $0x310] sm:$0x1] }
  0x5e   : > { %625 = vst [vmem:[%s966_s17 + $0x2e8] sm:$0xff] %v513_v26  ;;  %v516_v35 = vmax.f32 %v291_v32, %v862_v33  ;;  %v864_v38 = vld [vmem:[%s961_s14 + $0x690] sm:$0x1]  ;;  %626 = vst [vmem:[%s966_s17 + $0x2f0] sm:$0xff] %v514_v30  ;;  %v517_v39 = vmax.f32 %v292_v34, %v863_v36  ;;  %v294_v41 = vld [vmem:[%s961_s14 + $0x318] sm:$0x1] }
  0x5f   : > { %627 = vst [vmem:[%s966_s17 + $0x2f8] sm:$0xff] %v515_v31  ;;  %v518_v40 = vmax.f32 %v293_v37, %v864_v38  ;;  %v865_v42 = vld [vmem:[%s961_s14 + $0x698] sm:$0x1]  ;;  %v295_v43 = vld [vmem:[%s961_s14 + $0x320] sm:$0x1] }
  0x60   : > { %628 = vst [vmem:[%s966_s17 + $0x300] sm:$0x1] %v516_v35  ;;  %v519_v44 = vmax.f32 %v294_v41, %v865_v42  ;;  %v866_v45 = vld [vmem:[%s961_s14 + $0x6a0] sm:$0x1]  ;;  %v296_v46 = vld [vmem:[%s961_s14 + $0x328] sm:$0x1] }
  0x61   : > { %v867_v47 = vld [vmem:[%s961_s14 + $0x6a8] sm:$0x1]  ;;  %629 = vst [vmem:[%s966_s17 + $0x308] sm:$0x1] %v517_v39  ;;  %630 = vst [vmem:[%s966_s17 + $0x310] sm:$0x1] %v518_v40  ;;  %v520_v48 = vmax.f32 %v295_v43, %v866_v45 }
  0x62   : > { %v521_v49 = vmax.f32 %v296_v46, %v867_v47  ;;  %v297_v50 = vld [vmem:[%s961_s14 + $0x330] sm:$0x1]  ;;  %v298_v52 = vld [vmem:[%s961_s14 + $0x338] sm:$0x1]  ;;  %631 = vst [vmem:[%s966_s17 + $0x318] sm:$0x1] %v519_v44 }
  0x63   : > { %v868_v51 = vld [vmem:[%s961_s14 + $0x6b0] sm:$0x1]  ;;  %v869_v54 = vld [vmem:[%s961_s14 + $0x6b8] sm:$0x1]  ;;  %v299_v55 = vld [vmem:[%s961_s14 + $0x340] sm:$0x1] }
  0x64   : > { %v522_v53 = vmax.f32 %v297_v50, %v868_v51  ;;  %v870_v56 = vld [vmem:[%s961_s14 + $0x6c0] sm:$0x1]  ;;  %632 = vst [vmem:[%s966_s17 + $0x320] sm:$0x1] %v520_v48  ;;  %633 = vst [vmem:[%s966_s17 + $0x328] sm:$0x1] %v521_v49  ;;  %v523_v57 = vmax.f32 %v298_v52, %v869_v54 }
  0x65   : > { %v524_v58 = vmax.f32 %v299_v55, %v870_v56  ;;  %v300_v59 = vld [vmem:[%s961_s14 + $0x348] sm:$0x1]  ;;  %v301_v61 = vld [vmem:[%s961_s14 + $0x350] sm:$0x1]  ;;  %v302_v0 = vld [vmem:[%s961_s14 + $0x358] sm:$0x1] }
  0x66   : > { %v871_v60 = vld [vmem:[%s961_s14 + $0x6c8] sm:$0x1]  ;;  %634 = vst [vmem:[%s966_s17 + $0x330] sm:$0x1] %v522_v53  ;;  %v872_v63 = vld [vmem:[%s961_s14 + $0x6d0] sm:$0x1] }
  0x67   : > { %v525_v62 = vmax.f32 %v300_v59, %v871_v60  ;;  %v873_v1 = vld [vmem:[%s961_s14 + $0x6d8] sm:$0x1]  ;;  %635 = vst [vmem:[%s966_s17 + $0x338] sm:$0x1] %v523_v57  ;;  %636 = vst [vmem:[%s966_s17 + $0x340] sm:$0x1] %v524_v58  ;;  %v526_v2 = vmax.f32 %v301_v61, %v872_v63 }
  0x68   : > { %v527_v3 = vmax.f32 %v302_v0, %v873_v1  ;;  %v303_v4 = vld [vmem:[%s961_s14 + $0x360] sm:$0x1]  ;;  %v304_v6 = vld [vmem:[%s961_s14 + $0x368] sm:$0x1]  ;;  %v305_v9 = vld [vmem:[%s961_s14 + $0x370] sm:$0x1] }
  0x69   : > { %v874_v5 = vld [vmem:[%s961_s14 + $0x6e0] sm:$0x1]  ;;  %637 = vst [vmem:[%s966_s17 + $0x348] sm:$0x1] %v525_v62  ;;  %v875_v8 = vld [vmem:[%s961_s14 + $0x6e8] sm:$0x1] }
  0x6a   : > { %v528_v7 = vmax.f32 %v303_v4, %v874_v5  ;;  %v876_v10 = vld [vmem:[%s961_s14 + $0x6f0] sm:$0x1]  ;;  %638 = vst [vmem:[%s966_s17 + $0x350] sm:$0x1] %v526_v2  ;;  %639 = vst [vmem:[%s966_s17 + $0x358] sm:$0x1] %v527_v3  ;;  %v529_v11 = vmax.f32 %v304_v6, %v875_v8 }
  0x6b   : > { %v530_v12 = vmax.f32 %v305_v9, %v876_v10  ;;  %v306_v13 = vld [vmem:[%s961_s14 + $0x378] sm:$0x1] }
  0x6c   : > { %v877_v14 = vld [vmem:[%s961_s14 + $0x6f8] sm:$0x1]  ;;  %640 = vst [vmem:[%s966_s17 + $0x360] sm:$0x1] %v528_v7  ;;  %641 = vst [vmem:[%s966_s17 + $0x368] sm:$0x1] %v529_v11 }
  0x6d   : > { %v531_v15 = vmax.f32 %v306_v13, %v877_v14  ;;  %642 = vst [vmem:[%s966_s17 + $0x370] sm:$0x1] %v530_v12 }
  0x6f   : > { %643 = vst [vmem:[%s966_s17 + $0x378] sm:$0x1] %v531_v15 }
  0x70 PF: > { %s11_s8 = sadd.s32 1, %s928_s8   ;;  %s1315_s6 = smov %s924_s7 }
  0x71   : > { %p8_p5 = scmp.ge.s32.totalorder %s11_s8, 4   ;;  %s1316_s7 = smov %s1318_s9 }
  0x73   :  { %10 = sbr.rel (!%p8_p5) target bundleno = 2 (0x2), region = 55 }

</bundles_post_ra>
